<compile_context>
chip_gen: v7x
topology: tpu7x:2x2x1
jax: 0.10.0
libtpu: 0.0.40
codegen_flags: <defaults>
</compile_context>

<pallas_src>
import functools

import jax
import jax.numpy as jnp
from jax.experimental import pallas as pl
from jax.experimental.pallas import tpu as pltpu


def _ffn_kernel(x_ref, w1_ref, b1_ref, w2_ref, b2_ref, o_ref, acc_ref):
    # x_ref:  (tm, D)    w1_ref: (D, tf)   b1_ref: (1, tf)
    # w2_ref: (tf, D)    b2_ref: (1, D)    o_ref:  (tm, D)
    # acc_ref: (tm, D) f32 accumulator, resident across the F grid axis.
    f = pl.program_id(1)

    @pl.when(f == 0)
    def _init():
        # Fold the fc2 bias into the accumulator init: removes a (tm, D) f32
        # add + broadcast from the epilogue that sits after the last MXU push.
        acc_ref[...] = jnp.broadcast_to(
            b2_ref[...].astype(jnp.float32), acc_ref.shape)

    # fc1 tile + bias + ReLU (f32 accumulation on the MXU).
    h = jnp.dot(x_ref[...], w1_ref[...], preferred_element_type=jnp.float32)
    h = h + b1_ref[...].astype(jnp.float32)
    h = jnp.maximum(h, 0.0)
    # TODO(synk): training-mode dropout (pltpu.prng_random_bits mask) not
    # implemented; eval-mode dropout is identity, matching inference semantics.

    # fc2 partial product for this F tile; cast back to the (bf16) weight dtype
    # so the second matmul also runs at full MXU rate, accumulate in f32.
    acc_ref[...] += jnp.dot(h.astype(w2_ref.dtype), w2_ref[...],
                            preferred_element_type=jnp.float32)

    @pl.when(f == pl.num_programs(1) - 1)
    def _finalize():
        o_ref[...] = acc_ref[...].astype(o_ref.dtype)


def _round_up(x, m):
    return (x + m - 1) // m * m


# Per-generation tiling policy.
#   tm_small : token tile when weights are VMEM-resident (tf == d_ff)
#   tm_large : token tile when weights are re-streamed per M tile (tf < d_ff)
#   f_gran   : granularity of F-tile candidates (MXU contraction width)
#   vmem_budget / vmem_cap : tile-selection budget / hard vmem_limit cap
_GEN_CONFIG = {
    "v5e": dict(tm_small=256, tm_large=256, f_gran=128,
                vmem_budget=100 << 20, vmem_cap=110 << 20),
    "v6e": dict(tm_small=256, tm_large=768, f_gran=256,
                vmem_budget=100 << 20, vmem_cap=110 << 20),
    "v7x": dict(tm_small=256, tm_large=512, f_gran=256,
                vmem_budget=36 << 20, vmem_cap=50 << 20),
    # Unknown hardware: conservative (v7x-like) sizing.
    "default": dict(tm_small=256, tm_large=512, f_gran=256,
                    vmem_budget=36 << 20, vmem_cap=48 << 20),
}


def _tpu_generation():
    try:
        kind = jax.devices()[0].device_kind.lower()
    except Exception:
        return "default"
    if "v7" in kind:
        return "v7x"
    if "v6" in kind:
        return "v6e"
    if "v5" in kind:
        return "v5e"
    return "default"


def _vmem_estimate(tm, model_dim, tf, w_bytes, io_bytes):
    """Rough double-buffered VMEM working-set size for one grid step."""
    return (2 * tm * model_dim * io_bytes                      # x (2 bufs)
            + 2 * tm * model_dim * io_bytes                    # out (2 bufs)
            + 2 * (model_dim * tf + tf * model_dim) * w_bytes  # W1 + W2 (2 bufs)
            + 2 * (tf + model_dim) * w_bytes                   # b1 + b2 (2 bufs)
            + tm * model_dim * 4                               # f32 accumulator
            + tm * tf * 4)                                     # f32 intermediate h


def _f_tile_candidates(d_ff, gran):
    """F-tile candidates, largest first: d_ff itself, then gran-multiple
    divisors of d_ff."""
    cands = [d_ff]
    for k in range(d_ff // gran, 0, -1):
        tf = gran * k
        if tf < d_ff and d_ff % tf == 0:
            cands.append(tf)
    return cands


def _choose_f_tile(d_ff, model_dim, tm, w_bytes, io_bytes, budget, gran):
    """Largest F-tile candidate that keeps the estimated VMEM working set
    under budget (bias toward fewer F steps); falls back to the smallest
    candidate, which the caller validates against the hard VMEM cap."""
    cands = _f_tile_candidates(d_ff, gran)
    for tf in cands:
        if _vmem_estimate(tm, model_dim, tf, w_bytes, io_bytes) <= budget:
            return tf
    return cands[-1]


@functools.partial(jax.jit,
                   static_argnames=("tm", "f_tile", "vmem_budget_bytes"))
def feed_forward(x, w1, b1, w2, b2, *, tm=None, f_tile=None,
                 vmem_budget_bytes=None):
    """x: (batch, seq, model_dim) -> (batch, seq, model_dim).

    For best MXU utilization on v6e/v7x, model_dim and d_ff should be
    multiples of 256 (the MXU is 2x256x256 on those generations).
    """
    batch, seq, model_dim = x.shape
    d_ff = w1.shape[1]
    m = batch * seq

    gen = _tpu_generation()
    cfg = _GEN_CONFIG.get(gen, _GEN_CONFIG["default"])

    io_bytes = jnp.dtype(x.dtype).itemsize
    w_bytes = jnp.dtype(w1.dtype).itemsize
    # Round the token tile to the dtype sublane pack (16 for bf16, 32 for
    # int8/fp8, 8 for f32) to avoid masked/packed sublane handling.
    pack = max(8, 32 // io_bytes)

    budget = cfg["vmem_budget"] if vmem_budget_bytes is None else vmem_budget_bytes
    cap = cfg["vmem_cap"]

    def clamp_tm(t):
        return _round_up(min(t, _round_up(m, pack)), pack)

    if f_tile is not None:
        assert d_ff % f_tile == 0, "f_tile must divide d_ff"
        tf = f_tile
        if tm is not None:
            tm_eff = clamp_tm(tm)
        else:
            tm_eff = clamp_tm(cfg["tm_large"] if tf < d_ff else cfg["tm_small"])
    elif tm is not None:
        tm_eff = clamp_tm(tm)
        tf = _choose_f_tile(d_ff, model_dim, tm_eff, w_bytes, io_bytes,
                            budget, cfg["f_gran"])
    else:
        # Start small; if weights fit VMEM at tm_small (tf == d_ff) they are
        # fetched once total and a small token tile is enough.  Otherwise the
        # weights get re-streamed per M tile, so grow tm until the per-weight-
        # byte arithmetic intensity clears the generation's HBM roofline.
        tm_eff = clamp_tm(cfg["tm_small"])
        tf = _choose_f_tile(d_ff, model_dim, tm_eff, w_bytes, io_bytes,
                            budget, cfg["f_gran"])
        if tf < d_ff:
            tm_eff = clamp_tm(cfg["tm_large"])
            tf = _choose_f_tile(d_ff, model_dim, tm_eff, w_bytes, io_bytes,
                                budget, cfg["f_gran"])

    # v7x has 2 TensorCores sharing the "parallel" M axis: keep >= 2 M tiles
    # whenever there is enough work, so neither core sits idle.
    if gen == "v7x" and m > pack:
        two_tile_max = _round_up((m + 1) // 2, pack)
        if tm_eff > two_tile_max:
            tm_eff = two_tile_max

    m_pad = _round_up(m, tm_eff)

    vmem_est = _vmem_estimate(tm_eff, model_dim, tf, w_bytes, io_bytes)
    if vmem_est > cap:
        raise ValueError(
            f"FFN tiling (tm={tm_eff}, tf={tf}) needs ~{vmem_est >> 20} MiB "
            f"VMEM, above the {cap >> 20} MiB cap for TPU '{gen}'. Pass a "
            f"smaller f_tile/tm explicitly.")
    # Explicit scoped-VMEM limit: estimate + headroom, capped per generation.
    vmem_limit = int(min(vmem_est + (16 << 20), cap))

    x2d = x.reshape(m, model_dim)
    if m_pad != m:
        x2d = jnp.pad(x2d, ((0, m_pad - m), (0, 0)))
    b1_2d = b1.reshape(1, d_ff)
    b2_2d = b2.reshape(1, model_dim)

    n_m_tiles = m_pad // tm_eff
    # Weights are re-read once per M tile when tf < d_ff; read once when the
    # weights are VMEM-resident (all weight block indices constant over M).
    weight_reads = n_m_tiles if tf < d_ff else 1
    weight_bytes = (2 * model_dim * d_ff + d_ff + model_dim) * w_bytes
    cost = pl.CostEstimate(
        flops=int(4 * m_pad * model_dim * d_ff),          # two matmuls
        transcendentals=0,
        bytes_accessed=int(2 * m_pad * model_dim * io_bytes
                           + weight_reads * weight_bytes),
    )

    # NOTE: if xprof shows exposed weight DMA at F-step boundaries on v6e,
    # add pipeline_mode=pl.Buffered(3) to the W1/W2 BlockSpecs (128 MiB VMEM
    # has headroom there; do not do this on v7x).
    out2d = pl.pallas_call(
        _ffn_kernel,
        out_shape=jax.ShapeDtypeStruct((m_pad, model_dim), x.dtype),
        grid_spec=pltpu.PrefetchScalarGridSpec(
            num_scalar_prefetch=0,
            grid=(n_m_tiles, d_ff // tf),                  # (M parallel, F reduce)
            in_specs=[
                pl.BlockSpec((tm_eff, model_dim), lambda i, f: (i, 0)),  # x tile
                pl.BlockSpec((model_dim, tf), lambda i, f: (0, f)),      # W1 tile
                pl.BlockSpec((1, tf), lambda i, f: (0, f)),              # b1 tile
                pl.BlockSpec((tf, model_dim), lambda i, f: (f, 0)),      # W2 tile
                pl.BlockSpec((1, model_dim), lambda i, f: (0, 0)),       # b2
            ],
            out_specs=pl.BlockSpec((tm_eff, model_dim), lambda i, f: (i, 0)),
            scratch_shapes=[pltpu.VMEM((tm_eff, model_dim), jnp.float32)],
        ),
        compiler_params=pltpu.CompilerParams(
            dimension_semantics=("parallel", "arbitrary"),
            vmem_limit_bytes=vmem_limit,
        ),
        cost_estimate=cost,
    )(x2d, w1, b1_2d, w2, b2_2d)

    if m_pad != m:
        out2d = out2d[:m]
    return out2d.reshape(batch, seq, model_dim)


def init_params(key, model_dim, d_ff, dtype=jnp.bfloat16):
    """Deterministic nn.Linear-style init (uniform(-1/sqrt(fan_in), +))."""
    k1, k2, k3, k4 = jax.random.split(key, 4)
    lim1 = 1.0 / (model_dim ** 0.5)
    lim2 = 1.0 / (d_ff ** 0.5)
    # Stored as (in_dim, out_dim) == transpose of PyTorch's .weight
    w1 = jax.random.uniform(k1, (model_dim, d_ff), jnp.float32, -lim1, lim1)
    b1 = jax.random.uniform(k2, (d_ff,), jnp.float32, -lim1, lim1)
    w2 = jax.random.uniform(k3, (d_ff, model_dim), jnp.float32, -lim2, lim2)
    b2 = jax.random.uniform(k4, (model_dim,), jnp.float32, -lim2, lim2)
    return (w1.astype(dtype), b1.astype(dtype),
            w2.astype(dtype), b2.astype(dtype))


if __name__ == "__main__":
    # Small demo shapes; model_dim is a multiple of 256 (MXU-friendly on
    # v6e/v7x).  The explicit f_tile=512 run exercises the multi-step F
    # accumulation path (with b2 folded into the accumulator init); the
    # auto-tiled run exercises the weights-resident (tf == d_ff) path.
    batch, seq, model_dim, d_ff = 2, 8, 256, 1024

    key = jax.random.PRNGKey(0)
    kx, kp = jax.random.split(key)
    x = jax.random.normal(kx, (batch, seq, model_dim),
                          jnp.float32).astype(jnp.bfloat16)
    w1, b1, w2, b2 = init_params(kp, model_dim, d_ff, dtype=jnp.bfloat16)

    out_tiled = jax.block_until_ready(
        feed_forward(x, w1, b1, w2, b2, f_tile=512))
    out_auto = jax.block_until_ready(
        feed_forward(x, w1, b1, w2, b2))

    # Reference in plain JAX (f32; eval-mode dropout = identity).
    xf = x.astype(jnp.float32).reshape(-1, model_dim)
    ref = jnp.maximum(xf @ w1.astype(jnp.float32) + b1.astype(jnp.float32), 0.0)
    ref = ref @ w2.astype(jnp.float32) + b2.astype(jnp.float32)
    ref = ref.reshape(batch, seq, model_dim)

    for out in (out_tiled, out_auto):
        assert out.shape == (batch, seq, model_dim)
        assert jnp.allclose(out.astype(jnp.float32), ref,
                            atol=5e-2, rtol=5e-2), (
            float(jnp.max(jnp.abs(out.astype(jnp.float32) - ref))))

    print("KERNEL_OK")
</pallas_src>

<mosaic_0001>
module attributes {stable_mosaic.version = 11 : i64} {
  func.func @_ffn_kernel(%arg0: i32, %arg1: i32, %arg2: memref<16x256xbf16, #tpu.memory_space<vmem>>, %arg3: memref<256x512xbf16, #tpu.memory_space<vmem>>, %arg4: memref<1x512xbf16, #tpu.memory_space<vmem>>, %arg5: memref<512x256xbf16, #tpu.memory_space<vmem>>, %arg6: memref<1x256xbf16, #tpu.memory_space<vmem>>, %arg7: memref<16x256xbf16, #tpu.memory_space<vmem>>, %arg8: memref<16x256xf32, #tpu.memory_space<vmem>>) attributes {dimension_semantics = [#tpu.dimension_semantics<parallel>, #tpu.dimension_semantics<arbitrary>], iteration_bounds = array<i64: 1, 2>, scalar_prefetch = 0 : i64, scratch_operands = 1 : i64, tpu.core_type = #tpu.core_type<tc>, window_params = [{transform_indices = @transform_0, window_bounds = array<i64: 16, 256>}, {transform_indices = @transform_1, window_bounds = array<i64: 256, 512>}, {transform_indices = @transform_2, window_bounds = array<i64: 1, 512>}, {transform_indices = @transform_3, window_bounds = array<i64: 512, 256>}, {pipeline_mode = #tpu.pipeline_mode<synchronous>, transform_indices = @transform_4, window_bounds = array<i64: 1, 256>}, {transform_indices = @transform_5, window_bounds = array<i64: 16, 256>}]} {
    %c0_i32 = arith.constant 0 : i32
    %0 = arith.cmpi eq, %arg1, %c0_i32 : i32
    %1 = arith.extui %0 : i1 to i32
    %c0_i32_0 = arith.constant 0 : i32
    %2 = arith.cmpi ne, %1, %c0_i32_0 : i32
    scf.if %2 {
      %c0_15 = arith.constant 0 : index
      %c0_16 = arith.constant 0 : index
      %21 = vector.load %arg6[%c0_15, %c0_16] : memref<1x256xbf16, #tpu.memory_space<vmem>>, vector<1x256xbf16>
      %22 = arith.extf %21 : vector<1x256xbf16> to vector<1x256xf32>
      %23 = vector.shape_cast %22 : vector<1x256xf32> to vector<1x256xf32>
      %24 = vector.broadcast %23 : vector<1x256xf32> to vector<16x256xf32>
      %c0_17 = arith.constant 0 : index
      %c0_18 = arith.constant 0 : index
      %25 = vector.load %arg8[%c0_17, %c0_18] : memref<16x256xf32, #tpu.memory_space<vmem>>, vector<16x256xf32>
      tpu.vector_store %arg8[%c0_17, %c0_18], %24 {strides = array<i32>} : memref<16x256xf32, #tpu.memory_space<vmem>>, vector<16x256xf32>,
    } else {
    }
    %c0 = arith.constant 0 : index
    %c0_1 = arith.constant 0 : index
    %3 = vector.load %arg2[%c0, %c0_1] : memref<16x256xbf16, #tpu.memory_space<vmem>>, vector<16x256xbf16>
    %c0_2 = arith.constant 0 : index
    %c0_3 = arith.constant 0 : index
    %4 = vector.load %arg3[%c0_2, %c0_3] : memref<256x512xbf16, #tpu.memory_space<vmem>>, vector<256x512xbf16>
    %cst = arith.constant dense<0.000000e+00> : vector<16x512xf32>
    %5 = tpu.matmul %3, %4, %cst {dimension_numbers = #tpu.dot_dimension_numbers<[1], [0], [0], [1], [0, 0, 1, 1], [], []>} : vector<16x256xbf16>, vector<256x512xbf16>, vector<16x512xf32> -> vector<16x512xf32>
    %c0_4 = arith.constant 0 : index
    %c0_5 = arith.constant 0 : index
    %6 = vector.load %arg4[%c0_4, %c0_5] : memref<1x512xbf16, #tpu.memory_space<vmem>>, vector<1x512xbf16>
    %7 = arith.extf %6 : vector<1x512xbf16> to vector<1x512xf32>
    %8 = vector.broadcast %7 : vector<1x512xf32> to vector<16x512xf32>
    %9 = arith.addf %5, %8 : vector<16x512xf32>
    %cst_6 = arith.constant 0.000000e+00 : f32
    %10 = vector.broadcast %cst_6 : f32 to vector<16x512xf32>
    %11 = arith.maximumf %9, %10 : vector<16x512xf32>
    %c0_7 = arith.constant 0 : index
    %c0_8 = arith.constant 0 : index
    %12 = vector.load %arg8[%c0_7, %c0_8] : memref<16x256xf32, #tpu.memory_space<vmem>>, vector<16x256xf32>
    %13 = arith.truncf %11 : vector<16x512xf32> to vector<16x512xbf16>
    %c0_9 = arith.constant 0 : index
    %c0_10 = arith.constant 0 : index
    %14 = vector.load %arg5[%c0_9, %c0_10] : memref<512x256xbf16, #tpu.memory_space<vmem>>, vector<512x256xbf16>
    %cst_11 = arith.constant dense<0.000000e+00> : vector<16x256xf32>
    %15 = tpu.matmul %13, %14, %cst_11 {dimension_numbers = #tpu.dot_dimension_numbers<[1], [0], [0], [1], [0, 0, 1, 1], [], []>} : vector<16x512xbf16>, vector<512x256xbf16>, vector<16x256xf32> -> vector<16x256xf32>
    %16 = arith.addf %12, %15 : vector<16x256xf32>
    %c0_12 = arith.constant 0 : index
    %c0_13 = arith.constant 0 : index
    %17 = vector.load %arg8[%c0_12, %c0_13] : memref<16x256xf32, #tpu.memory_space<vmem>>, vector<16x256xf32>
    tpu.vector_store %arg8[%c0_12, %c0_13], %16 {strides = array<i32>} : memref<16x256xf32, #tpu.memory_space<vmem>>, vector<16x256xf32>,
    %c1_i32 = arith.constant 1 : i32
    %18 = arith.cmpi eq, %arg1, %c1_i32 : i32
    %19 = arith.extui %18 : i1 to i32
    %c0_i32_14 = arith.constant 0 : i32
    %20 = arith.cmpi ne, %19, %c0_i32_14 : i32
    scf.if %20 {
      %c0_15 = arith.constant 0 : index
      %c0_16 = arith.constant 0 : index
      %21 = vector.load %arg8[%c0_15, %c0_16] : memref<16x256xf32, #tpu.memory_space<vmem>>, vector<16x256xf32>
      %22 = arith.truncf %21 : vector<16x256xf32> to vector<16x256xbf16>
      %c0_17 = arith.constant 0 : index
      %c0_18 = arith.constant 0 : index
      %23 = vector.load %arg7[%c0_17, %c0_18] : memref<16x256xbf16, #tpu.memory_space<vmem>>, vector<16x256xbf16>
      tpu.vector_store %arg7[%c0_17, %c0_18], %22 {strides = array<i32>} : memref<16x256xbf16, #tpu.memory_space<vmem>>, vector<16x256xbf16>,
    } else {
    }
    return
  }
  func.func @transform_0(%arg0: i32, %arg1: i32) -> (i32, i32) {
    %c0_i32 = arith.constant 0 : i32
    %c0_i32_0 = arith.constant 0 : i32
    return %arg0, %c0_i32 : i32, i32
  }
  func.func @transform_1(%arg0: i32, %arg1: i32) -> (i32, i32) {
    %c0_i32 = arith.constant 0 : i32
    %c0_i32_0 = arith.constant 0 : i32
    return %c0_i32, %arg1 : i32, i32
  }
  func.func @transform_2(%arg0: i32, %arg1: i32) -> (i32, i32) {
    %c0_i32 = arith.constant 0 : i32
    %c0_i32_0 = arith.constant 0 : i32
    return %c0_i32, %arg1 : i32, i32
  }
  func.func @transform_3(%arg0: i32, %arg1: i32) -> (i32, i32) {
    %c0_i32 = arith.constant 0 : i32
    %c0_i32_0 = arith.constant 0 : i32
    return %arg1, %c0_i32 : i32, i32
  }
  func.func @transform_4(%arg0: i32, %arg1: i32) -> (i32, i32) {
    %c0_i32 = arith.constant 0 : i32
    %c0_i32_0 = arith.constant 0 : i32
    %c0_i32_1 = arith.constant 0 : i32
    return %c0_i32, %c0_i32_0 : i32, i32
  }
  func.func @transform_5(%arg0: i32, %arg1: i32) -> (i32, i32) {
    %c0_i32 = arith.constant 0 : i32
    %c0_i32_0 = arith.constant 0 : i32
    return %arg0, %c0_i32 : i32, i32
  }
}

</mosaic_0001>

<bundles_post_ra>
// kernel: feed_forward.1
= control target key start
LH: loop header
LB: loop body
LE: loop exit
PB: predicated region body
PF: predicated region fallthrough
CT: control target
= control target key end

     0   :  { %10 = vsyncpa [#allocation4], 0  ;;  %s2524_s0 = inlined_call_operand.vmem [shape: bf16[16,256], index: 0, kind: input, shape index: {}]   ;;  %s2525_s1 = inlined_call_operand.hbm [shape: bf16[256,1024], index: 1, kind: input, shape index: {}]   ;;  %s2526_s2 = inlined_call_operand.vmem [shape: bf16[1,1024], index: 2, kind: input, shape index: {}]   ;;  %s2527_s3 = inlined_call_operand.hbm [shape: bf16[1024,256], index: 3, kind: input, shape index: {}]   ;;  %s2528_s4 = inlined_call_operand.vmem [shape: bf16[1,256], index: 4, kind: input, shape index: {}]   ;;  %s2529_s5 = inlined_call_operand.hbm [shape: bf16[16,256], index: 5, kind: output, shape index: {}]  }
   0x1   :  { %12 = vsyncpa [#allocation4 + $0x1], 0 }
   0x2   :  { %13 = vsyncpa [#allocation7], 0 }
   0x3   :  { %15 = vsyncpa [#allocation7 + $0x1], 0 }
   0x4   :  { %16 = vsyncpa [#allocation5], 0  ;;  %s2140_s18 = smov 0   ;;  %s2142_s19 = smov 0  }
   0x5   :  { %s2144_s20 = smov 0   ;;  %s2146_s21 = smov 0  }
   0x6   :  { %s2148_s22 = smov 0   ;;  %s2150_s23 = smov 0  }
   0x7 LB: > { %s1523_s24 = sadd.s32 4294967295, %s2098_s23   ;;  %s31_s25 = sadd.s32 1, %s2094_s22  ;;  %s2098_s23 = sphi %s2150_s23, %s22_s23   ;;  %s2094_s22 = sphi %s2148_s22, %s2542_s22   ;;  %s2090_s21 = sphi %s2146_s21, %s2541_s21   ;;  %s2086_s20 = sphi %s2144_s20, %s2540_s20   ;;  %s2082_s19 = sphi %s2142_s19, %s2539_s19   ;;  %s2078_s18 = sphi %s2140_s18, %s2538_s18  }
   0x8   : > { %p32_p0 = scmp.ge.s32.totalorder %s31_s25, 2  ;;  %s67_s26 = sadd.s32 1, %s2086_s20 }
   0x9   : > { %p74_p1 = scmp.ne.s32.totalorder %s2086_s20, %s2082_s19  ;;  %p75_p2 = scmp.eq.s32.totalorder %s2098_s23, 0 }
   0xa   : > { %s2544_s25 = smov (%p32_p0, %s31_s25), 0  ;;  %p80_p4 = scmp.ne.s32.totalorder %s2082_s19, %s2078_s18 }
   0xb   : > { %p2176_p3 = por %p75_p2, %p74_p1  ;;  %s64_s28 = ssub.s32 %s2094_s22, %s2544_s25 }
   0xc   : > { %p81_p5 = scmp.eq.s32.totalorder %s1523_s24, 0  ;;  %p65_p6 = scmp.eq.s32.totalorder %s64_s28, 0 }
   0xd   : > { %p1700_p8 = scmp.lt.s32.totalorder %s2098_s23, 2  ;;  %s2194_s6 = sand.u32 1, %s2086_s20  }
   0xe   : > { %p2185_p7 = por %p81_p5, %p80_p4  ;;  %s1676_s7 = sshll.u32 %s2094_s22, 8 }
   0xf   : > { %s2191_s30 = scalar_select %p65_p6, %s2086_s20, %s67_s26  }
  0x10   : > { %s2532_s29 = scalar_select %p2185_p7, 1, 0 }
  0x11   : > { %s1527_s8 = sshll.u32 %s2194_s6, 9  ;;  %s2201_s11 = scalar_lea.hbm %s2525_s1, %s1676_s7 }
  0x12   : > { %s220_s12 = scalar_lea.vmem [#allocation3], %s1527_s8  ;;  %p2207_p9 = pnand %p1700_p8, %p2176_p3 }
  0x13   : > { %s227_s13 = sshll.u32 %s220_s12, 4  ;;  %s217_s15 = scalar_lea.sflag [#allocation4], %s2194_s6  ;;  %s2211_s13 = int_to_ptr.vmem [resolvable:$true] %s227_s13 }
  0x14   : > { %s1954_s16 = scalar_lea.hbm %s2201_s11, 8192  ;;  %p1956_p12 = pneg %p2207_p9 }
  0x15   : > { %p1955_p11 = scmp.ne.s32.totalorder %s2201_s11, %s1954_s16  ;;  %s1959_s26 = scalar_lea.hbm %s2525_s1, 16384 }
  0x16   : > { %p1960_p1 = scmp.lt.u32.totalorder %s2201_s11, %s2525_s1  ;;  %p1961_p2 = scmp.lt.u32.totalorder %s1959_s26, %s1954_s16 }
  0x17   : > { %p1957_p13 = pnand %p1956_p12, %p1955_p11  ;;  %p1963_p4 = scmp.lt.u32.totalorder %s1954_s16, %s2201_s11 }
  0x18   : > { %p1962_p3 = por %p1961_p2, %p1960_p1 }
  0x19   : > { %p1958_p0 = pneg %p1957_p13 }
  0x1a   : > { %p1964_p5 = por %p1963_p4, %p1962_p3 }
  0x1c   : > { %p1965_p6 = pnand %p1964_p5, %p1958_p0 }
  0x1e   : > { %1968 = shalt.err (!%p1965_p6)
}
  0x1f   : > { %s1969_s7 = scalar_lea.vmem %s2211_s13, 8192  ;;  %s2100_s9 = smov [#allocation3]  }
  0x20   : > { %p1970_p8 = scmp.ne.s32.totalorder %s2211_s13, %s1969_s7  ;;  %s1974_s10 = sshll.u32 %s2100_s9, 4  ;;  %s1975_s10 = int_to_ptr.vmem [resolvable:$false] %s1974_s10 }
  0x21   : > { %s1976_s12 = scalar_lea.vmem %s1975_s10, 16384  ;;  %p1977_p10 = scmp.lt.s32.totalorder %s2211_s13, %s1975_s10 }
  0x22   : > { %p1972_p11 = pnand %p1970_p8, %p1956_p12  ;;  %p1978_p1 = scmp.lt.s32.totalorder %s1976_s12, %s1969_s7 }
  0x24   : > { %p1973_p13 = pneg %p1972_p11  ;;  %p1979_p2 = por %p1978_p1, %p1977_p10 }
  0x26   : > { %p1980_p3 = pnand %p1979_p2, %p1973_p13 }
  0x28   : > { %1983 = shalt.err (!%p1980_p3)
}
  0x29   : > { %s2101_s16 = smov 512   ;;  %s2102_s17 = smov 256  }
  0x2a   : > { %s2103_s18 = smov 16   ;;  %p265_p0 = scmp.lt.s32.totalorder %s2098_s23, 3 }
  0x2b   : > { %1696 = dma.hbm_to_vmem [thread:$0]  (!%p2207_p9), %s2201_s11, 8192, %s2211_s13, %s217_s15, %s2101_s16, %s2102_s17, %s2103_s18  }
  0x2c   : > { %s1678_s26 = sshll.u32 %s2094_s22, 13  ;;  %p2534_p10 = scmp.ge.s32.totalorder %s2098_s23, 1 }
  0x2d   : > { %s2253_s9 = scalar_lea.hbm %s2527_s3, %s1678_s26  ;;  %s249_s10 = scalar_lea.vmem [#allocation6], %s1527_s8 }
  0x2e   : > { %p2246_p4 = pnand %p2534_p10, %p265_p0  ;;  %s257_s12 = sshll.u32 %s249_s10, 4  ;;  %s2257_s12 = int_to_ptr.vmem [resolvable:$true] %s257_s12 }
  0x2f   : > { %s246_s11 = scalar_lea.sflag [#allocation7], %s2194_s6  ;;  %s1984_s13 = scalar_lea.hbm %s2253_s9, 8192 }
  0x30   : > { %p1985_p5 = scmp.ne.s32.totalorder %s2253_s9, %s1984_s13  ;;  %s1989_s17 = scalar_lea.hbm %s2527_s3, 16384 }
  0x31   : > { %p1990_p11 = scmp.lt.u32.totalorder %s2253_s9, %s2527_s3  ;;  %p1991_p13 = scmp.lt.u32.totalorder %s1989_s17, %s1984_s13 }
  0x32   : > { %p1987_p6 = pnand %p1985_p5, %p1956_p12  ;;  %p1993_p2 = scmp.lt.u32.totalorder %s1984_s13, %s2253_s9 }
  0x33   : > { %p1992_p1 = por %p1991_p13, %p1990_p11 }
  0x34   : > { %p1988_p8 = pneg %p1987_p6 }
  0x35   : > { %p1994_p3 = por %p1993_p2, %p1992_p1 }
  0x37   : > { %p1995_p0 = pnand %p1994_p3, %p1988_p8 }
  0x39   : > { %1998 = shalt.err (!%p1995_p0)
}
  0x3a   : > { %s1999_s8 = scalar_lea.vmem %s2257_s12, 8192  ;;  %s2104_s28 = smov [#allocation6]  }
  0x3b   : > { %p2000_p10 = scmp.ne.s32.totalorder %s2257_s12, %s1999_s8  ;;  %s2004_s7 = sshll.u32 %s2104_s28, 4  ;;  %s2005_s7 = int_to_ptr.vmem [resolvable:$false] %s2004_s7 }
  0x3c   : > { %s2006_s10 = scalar_lea.vmem %s2005_s7, 16384  ;;  %p2007_p7 = scmp.lt.s32.totalorder %s2257_s12, %s2005_s7 }
  0x3d   : > { %p2002_p5 = pnand %p2000_p10, %p1956_p12  ;;  %p2008_p11 = scmp.lt.s32.totalorder %s2006_s10, %s1999_s8 }
  0x3f   : > { %p2003_p6 = pneg %p2002_p5  ;;  %p2009_p13 = por %p2008_p11, %p2007_p7 }
  0x41   : > { %p2010_p1 = pnand %p2009_p13, %p2003_p6 }
  0x43   : > { %2013 = shalt.err (!%p2010_p1)
}
  0x44   : > { %s2105_s13 = smov 128   ;;  %s2106_s15 = smov 8  }
  0x45   : > { %1699 = dma.hbm_to_vmem [thread:$0]  (!%p2207_p9), %s2253_s9, 8192, %s2257_s12, %s246_s11, %s2105_s13, %s2105_s13, %s2106_s15  }
  0x46   : > { %269 = sbr.rel (%p2246_p4) target bundleno = 698 (0x2ba), region = 40  ;;  %s271_s16 = sand.u32 (!%p2246_p4), 1, %s2082_s19  }
  0x47   : > { %s1535_s17 = sshll.u32 (!%p2246_p4), %s271_s16, 9  ;;  %s272_s18 = scalar_lea.sflag (!%p2246_p4), [#allocation4], %s271_s16 }
  0x48   : > { %s2288_s26 = scalar_lea.vmem (!%p2246_p4), [#allocation3], %s1535_s17  ;;  %p2536_p7 = scmp.ne.s32.totalorder (!%p2246_p4), %s2532_s29, 0 }
  0x4d   : > { %2065 = dma.done.wait (%p2536_p7), %s272_s18, 8192  }
  0x4e   : > { %2067 = vsyncadd (%p2536_p7), %s272_s18, 4294959104  ;;  %s281_s8 = scalar_lea.sflag [#allocation7], %s271_s16  ;;  %s2294_s14 = scalar_lea.vmem [#allocation6], %s1535_s17 }
  0x4f   : > { %2069 = dma.done.wait (%p2536_p7), %s281_s8, 8192  }
  0x50   : > { %2071 = vsyncadd (%p2536_p7), %s281_s8, 4294959104  ;;  %s1537_s6 = sshll.u32 %s2090_s21, 2  ;;  %p1538_p12 = scmp.ne.s32.totalorder %s2090_s21, 0 }
  0x51   : > { %p330_p9 = scmp.lt.s32.totalorder %s1537_s6, 7  ;;  %v340_v0 = vld [vmem:[%s2528_s4] sm:$0x3] (!%p1538_p12)  ;;  %v343_v1 = vlaneseq (!%p1538_p12) }
  0x52   : > { %339 = sbr.rel (%p1538_p12) target bundleno = 93 (0x5d), region = 52  ;;  %v341_v2 = vunpack.c.l.bf16 (!%p1538_p12), %v340_v0 }
  0x53   : > { %s2546_s6 = smov (!%p330_p9, %s1537_s6), 7  ;;  %v344_v3 = vshrl.u32 (!%p1538_p12), %v343_v1, 7 }
  0x54   : > { %s332_s12 = scalar_lea.vmem %s2526_s2, %s2546_s6 }
  0x55   : > { %v345_v4 = vsub.s32 (!%p1538_p12), 0, %v344_v3  ;;  %v349_v5 = vsub.s32 (!%p1538_p12), 2, %v344_v3 }
  0x57   : > { %v346_v6 = vrot.slane (!%p1538_p12), %v341_v2, %v345_v4  ;;  %v350_v7 = vrot.slane (!%p1538_p12), %v341_v2, %v349_v5 }
  0x59   : > { %v356_v8 = vrot.slane %v346_v6, %v345_v4  ;;  %v360_v9 = vrot.slane %v350_v7, %v345_v4 }
  0x5b   : > { %361 = vst [vmem:[#allocation2] sm:$0xff] %v356_v8  ;;  %363 = vst [vmem:[#allocation2 + $0x10] sm:$0xff] %v356_v8 }
  0x5c   : > { %362 = vst [vmem:[#allocation2 + $0x8] sm:$0xff] %v360_v9  ;;  %364 = vst [vmem:[#allocation2 + $0x18] sm:$0xff] %v360_v9 }
  0x5d PF: > { %v1759_v10 = vld [vmem:[%s2288_s26 + $0x4] ss:$16 sps:$4 sm:$0xff]   ;;  %v1761_v11 = vld [vmem:[%s2288_s26] ss:$16 sps:$4 sm:$0xff]   ;;  %v1812_v52 = vld [vmem:[%s2288_s26 + $0xc] ss:$16 sps:$4 sm:$0xff]  }
  0x5e   : > { %800 = vmatprep.subr.bf16.mxu1 %v1759_v10  ;;  %v1762_v12 = vld [vmem:[%s2288_s26 + $0x24] ss:$16 sps:$4 sm:$0xff]   ;;  %v1764_v13 = vld [vmem:[%s2288_s26 + $0x20] ss:$16 sps:$4 sm:$0xff]   ;;  %v1810_v56 = vld [vmem:[%s2288_s26 + $0x8] ss:$16 sps:$4 sm:$0xff]  }
  0x5f   : > { %801 = vmatpush1.bf16.msra.mxu1 %v1761_v11  ;;  %v1765_v14 = vld [vmem:[%s2288_s26 + $0x44] ss:$16 sps:$4 sm:$0xff]   ;;  %v1767_v15 = vld [vmem:[%s2288_s26 + $0x40] ss:$16 sps:$4 sm:$0xff]   ;;  %v1815_v57 = vld [vmem:[%s2288_s26 + $0x2c] ss:$16 sps:$4 sm:$0xff]  }
  0x60   : > { %802 = vmatprep.subr.bf16.mxu1 %v1762_v12  ;;  %v1768_v16 = vld [vmem:[%s2288_s26 + $0x64] ss:$16 sps:$4 sm:$0xff]   ;;  %v1770_v17 = vld [vmem:[%s2288_s26 + $0x60] ss:$16 sps:$4 sm:$0xff]   ;;  %v1813_v60 = vld [vmem:[%s2288_s26 + $0x28] ss:$16 sps:$4 sm:$0xff]  }
  0x61   : > { %v1771_v18 = vld [vmem:[%s2288_s26 + $0x84] ss:$16 sps:$4 sm:$0xff]   ;;  %v1773_v19 = vld [vmem:[%s2288_s26 + $0x80] ss:$16 sps:$4 sm:$0xff]   ;;  %v1818_v61 = vld [vmem:[%s2288_s26 + $0x4c] ss:$16 sps:$4 sm:$0xff]  }
  0x62   : > { %v1774_v20 = vld [vmem:[%s2288_s26 + $0xa4] ss:$16 sps:$4 sm:$0xff]   ;;  %v1776_v21 = vld [vmem:[%s2288_s26 + $0xa0] ss:$16 sps:$4 sm:$0xff]   ;;  %v1816_v0 = vld [vmem:[%s2288_s26 + $0x48] ss:$16 sps:$4 sm:$0xff]  }
  0x63   : > { %803 = vmatpush1.bf16.msra.mxu1 %v1764_v13  ;;  %v1777_v22 = vld [vmem:[%s2288_s26 + $0xc4] ss:$16 sps:$4 sm:$0xff]   ;;  %v1779_v24 = vld [vmem:[%s2288_s26 + $0xc0] ss:$16 sps:$4 sm:$0xff]   ;;  %v1821_v1 = vld [vmem:[%s2288_s26 + $0x6c] ss:$16 sps:$4 sm:$0xff]  }
  0x64   : > { %804 = vmatprep.subr.bf16.mxu1 %v1765_v14  ;;  %v2327_v23 = vld [vmem:[%s2524_s0 + $0x4] ss:$8 sps:$4 sm:$0xff]   ;;  %v1782_v26 = vld [vmem:[%s2288_s26 + $0xe0] ss:$16 sps:$4 sm:$0xff]   ;;  %v1861_v39 = vld [vmem:[%s2294_s14 + $0x14] ss:$8 sps:$4 sm:$0xff]  }
  0x65   : > { %v1780_v25 = vld [vmem:[%s2288_s26 + $0xe4] ss:$16 sps:$4 sm:$0xff]   ;;  %832 = vmatprep.mubr.bf16.mxu1 %v2327_v23  ;;  %v1785_v28 = vld [vmem:[%s2288_s26 + $0x100] ss:$16 sps:$4 sm:$0xff]   ;;  %v1819_v4 = vld [vmem:[%s2288_s26 + $0x68] ss:$16 sps:$4 sm:$0xff]  }
  0x66   : > { %v1783_v27 = vld [vmem:[%s2288_s26 + $0x104] ss:$16 sps:$4 sm:$0xff]   ;;  %v1788_v30 = vld [vmem:[%s2288_s26 + $0x120] ss:$16 sps:$4 sm:$0xff]   ;;  %v1824_v5 = vld [vmem:[%s2288_s26 + $0x8c] ss:$16 sps:$4 sm:$0xff]  }
  0x67   : > { %805 = vmatpush1.bf16.msra.mxu1 %v1767_v15  ;;  %v1786_v29 = vld [vmem:[%s2288_s26 + $0x124] ss:$16 sps:$4 sm:$0xff]   ;;  %v1791_v32 = vld [vmem:[%s2288_s26 + $0x140] ss:$16 sps:$4 sm:$0xff]   ;;  %v1822_v8 = vld [vmem:[%s2288_s26 + $0x88] ss:$16 sps:$4 sm:$0xff]  }
  0x68   : > { %806 = vmatprep.subr.bf16.mxu1 %v1768_v16  ;;  %v1789_v31 = vld [vmem:[%s2288_s26 + $0x144] ss:$16 sps:$4 sm:$0xff]   ;;  %v1794_v34 = vld [vmem:[%s2288_s26 + $0x160] ss:$16 sps:$4 sm:$0xff]   ;;  %v1827_v9 = vld [vmem:[%s2288_s26 + $0xac] ss:$16 sps:$4 sm:$0xff]  }
  0x69   : > { %v1792_v33 = vld [vmem:[%s2288_s26 + $0x164] ss:$16 sps:$4 sm:$0xff]   ;;  %v1860_v37 = vld [vmem:[%s2294_s14] ss:$8 sps:$4 sm:$0xff]   ;;  %v1863_v41 = vld [vmem:[%s2294_s14 + $0x10] ss:$8 sps:$4 sm:$0xff]  }
  0x6a   : > { %v1795_v35 = vld [vmem:[%s2288_s26 + $0x184] ss:$16 sps:$4 sm:$0xff]   ;;  %v1797_v38 = vld [vmem:[%s2288_s26 + $0x180] ss:$16 sps:$4 sm:$0xff]   ;;  %v1825_v12 = vld [vmem:[%s2288_s26 + $0xa8] ss:$16 sps:$4 sm:$0xff]  }
  0x6b   : > { %807 = vmatpush1.bf16.msra.mxu1 %v1770_v17  ;;  %v1858_v36 = vld [vmem:[%s2294_s14 + $0x4] ss:$8 sps:$4 sm:$0xff]   ;;  %v1800_v43 = vld [vmem:[%s2288_s26 + $0x1a0] ss:$16 sps:$4 sm:$0xff]   ;;  %v1867_v46 = vld [vmem:[%s2294_s14 + $0x34] ss:$8 sps:$4 sm:$0xff]  }
  0x6c   : > { %808 = vmatprep.subr.bf16.mxu1 %v1771_v18  ;;  %1286 = vmatprep.subr.bf16.mxu0 %v1858_v36  ;;  %v1798_v40 = vld [vmem:[%s2288_s26 + $0x1a4] ss:$16 sps:$4 sm:$0xff]   ;;  %v1866_v45 = vld [vmem:[%s2294_s14 + $0x20] ss:$8 sps:$4 sm:$0xff]   ;;  %v1869_v49 = vld [vmem:[%s2294_s14 + $0x30] ss:$8 sps:$4 sm:$0xff]  }
  0x6d   : > { %1287 = vmatpush1.bf16.msra.mxu0 %v1860_v37  ;;  %v1864_v42 = vld [vmem:[%s2294_s14 + $0x24] ss:$8 sps:$4 sm:$0xff]   ;;  %v1803_v47 = vld [vmem:[%s2288_s26 + $0x1c0] ss:$16 sps:$4 sm:$0xff]   ;;  %v1873_v55 = vld [vmem:[%s2294_s14 + $0x54] ss:$8 sps:$4 sm:$0xff]  }
  0x6e   : > { %1288 = vmatprep.subr.bf16.mxu0 %v1861_v39  ;;  %v1801_v44 = vld [vmem:[%s2288_s26 + $0x1c4] ss:$16 sps:$4 sm:$0xff]   ;;  %v1806_v51 = vld [vmem:[%s2288_s26 + $0x1e0] ss:$16 sps:$4 sm:$0xff]   ;;  %v1830_v13 = vld [vmem:[%s2288_s26 + $0xcc] ss:$16 sps:$4 sm:$0xff]  }
  0x6f   : > { %809 = vmatpush1.bf16.msra.mxu1 %v1773_v19  ;;  %v1804_v48 = vld [vmem:[%s2288_s26 + $0x1e4] ss:$16 sps:$4 sm:$0xff]   ;;  %v1872_v53 = vld [vmem:[%s2294_s14 + $0x40] ss:$8 sps:$4 sm:$0xff]   ;;  %v1875_v58 = vld [vmem:[%s2294_s14 + $0x50] ss:$8 sps:$4 sm:$0xff]  }
  0x70   : > { %810 = vmatprep.subr.bf16.mxu1 %v1774_v20  ;;  %v1870_v50 = vld [vmem:[%s2294_s14 + $0x44] ss:$8 sps:$4 sm:$0xff]   ;;  %v2363_v54 = vld [vmem:[%s2524_s0] ss:$8 sps:$4 sm:$0xff]   ;;  %v1879_v63 = vld [vmem:[%s2294_s14 + $0x74] ss:$8 sps:$4 sm:$0xff]  }
  0x71   : > { %1289 = vmatpush1.bf16.msra.mxu0 %v1863_v41  ;;  %v1876_v59 = vld [vmem:[%s2294_s14 + $0x64] ss:$8 sps:$4 sm:$0xff]   ;;  %v1878_v62 = vld [vmem:[%s2294_s14 + $0x60] ss:$8 sps:$4 sm:$0xff]   ;;  %v1881_v2 = vld [vmem:[%s2294_s14 + $0x70] ss:$8 sps:$4 sm:$0xff]  }
  0x72   : > { %1290 = vmatprep.subr.bf16.mxu0 %v1864_v42  ;;  %v1882_v3 = vld [vmem:[%s2294_s14 + $0x84] ss:$8 sps:$4 sm:$0xff]   ;;  %v1884_v6 = vld [vmem:[%s2294_s14 + $0x80] ss:$8 sps:$4 sm:$0xff]   ;;  %v1885_v7 = vld [vmem:[%s2294_s14 + $0x94] ss:$8 sps:$4 sm:$0xff]  }
  0x73   : > { %811 = vmatpush1.bf16.msra.mxu1 %v1776_v21  ;;  %v1887_v10 = vld [vmem:[%s2294_s14 + $0x90] ss:$8 sps:$4 sm:$0xff]   ;;  %v1888_v11 = vld [vmem:[%s2294_s14 + $0xa4] ss:$8 sps:$4 sm:$0xff]   ;;  %v1890_v14 = vld [vmem:[%s2294_s14 + $0xa0] ss:$8 sps:$4 sm:$0xff]  }
  0x74   : > { %812 = vmatprep.subr.bf16.mxu1 %v1777_v22  ;;  %v1891_v15 = vld [vmem:[%s2294_s14 + $0xb4] ss:$8 sps:$4 sm:$0xff]   ;;  %v1828_v16 = vld [vmem:[%s2288_s26 + $0xc8] ss:$16 sps:$4 sm:$0xff]   ;;  %v1894_v19 = vld [vmem:[%s2294_s14 + $0xc4] ss:$8 sps:$4 sm:$0xff]  }
  0x75   : > { %1291 = vmatpush1.bf16.msra.mxu0 %v1866_v45  ;;  %v1833_v17 = vld [vmem:[%s2288_s26 + $0xec] ss:$16 sps:$4 sm:$0xff]   ;;  %v1893_v18 = vld [vmem:[%s2294_s14 + $0xb0] ss:$8 sps:$4 sm:$0xff]   ;;  %v1896_v22 = vld [vmem:[%s2294_s14 + $0xc0] ss:$8 sps:$4 sm:$0xff]   ;;  %v434_v45 = vlaneseq }
  0x76   : > { %1292 = vmatprep.subr.bf16.mxu0 %v1867_v46  ;;  %v1831_v20 = vld [vmem:[%s2288_s26 + $0xe8] ss:$16 sps:$4 sm:$0xff]   ;;  %v1836_v21 = vld [vmem:[%s2288_s26 + $0x10c] ss:$16 sps:$4 sm:$0xff]   ;;  %p1669_p4 = scmp.ne.s32.totalorder %s2090_s21, 1 }
  0x77   : > { %813 = vmatpush1.bf16.msra.mxu1 %v1779_v24  ;;  %v1834_v24 = vld [vmem:[%s2288_s26 + $0x108] ss:$16 sps:$4 sm:$0xff]   ;;  %v1857_v37 = vld [vmem:[%s2288_s26 + $0x1ec] ss:$16 sps:$4 sm:$0xff]   ;;  %v2422_v46 = vshrl.u32 %v434_v45, 7 }
  0x78   : > { %814 = vmatprep.subr.bf16.mxu1 %v1780_v25  ;;  %v1839_v25 = vld [vmem:[%s2288_s26 + $0x12c] ss:$16 sps:$4 sm:$0xff]   ;;  %v1852_v36 = vld [vmem:[%s2288_s26 + $0x1c8] ss:$16 sps:$4 sm:$0xff]  }
  0x79   : > { %1293 = vmatpush1.bf16.msra.mxu0 %v1869_v49  ;;  %v1899_v39 = vld [vmem:[%s2294_s14 + $0xd0] ss:$8 sps:$4 sm:$0xff]   ;;  %v1902_v41 = vld [vmem:[%s2294_s14 + $0xe0] ss:$8 sps:$4 sm:$0xff]   ;;  %v1903_v42 = vld [vmem:[%s2294_s14 + $0xf4] ss:$8 sps:$4 sm:$0xff]  }
  0x7a   : > { %1294 = vmatprep.subr.bf16.mxu0 %v1870_v50  ;;  %v2432_v49 = vsub.s32 0, %v2422_v46  ;;  %v440_v50 = vsub.s32 2, %v2422_v46 }
  0x7b   : > { %815 = vmatpush1.bf16.msra.mxu1 %v1782_v26  ;;  %v1837_v26 = vld [vmem:[%s2288_s26 + $0x128] ss:$16 sps:$4 sm:$0xff]  }
  0x7c   : > { %816 = vmatprep.subr.bf16.mxu1 %v1783_v27  ;;  %v1842_v27 = vld [vmem:[%s2288_s26 + $0x14c] ss:$16 sps:$4 sm:$0xff]  }
  0x7d   : > { %1295 = vmatpush1.bf16.msra.mxu0 %v1872_v53 }
  0x7e   : > { %1296 = vmatprep.subr.bf16.mxu0 %v1873_v55 }
  0x7f   : > { %817 = vmatpush1.bf16.msra.mxu1 %v1785_v28  ;;  %v1840_v28 = vld [vmem:[%s2288_s26 + $0x148] ss:$16 sps:$4 sm:$0xff]  }
  0x80   : > { %818 = vmatprep.subr.bf16.mxu1 %v1786_v29  ;;  %v1845_v29 = vld [vmem:[%s2288_s26 + $0x16c] ss:$16 sps:$4 sm:$0xff]  }
  0x81   : > { %1297 = vmatpush1.bf16.msra.mxu0 %v1875_v58 }
  0x82   : > { %1298 = vmatprep.subr.bf16.mxu0 %v1876_v59 }
  0x83   : > { %819 = vmatpush1.bf16.msra.mxu1 %v1788_v30  ;;  %v1843_v30 = vld [vmem:[%s2288_s26 + $0x168] ss:$16 sps:$4 sm:$0xff]  }
  0x84   : > { %820 = vmatprep.subr.bf16.mxu1 %v1789_v31  ;;  %v1848_v31 = vld [vmem:[%s2288_s26 + $0x18c] ss:$16 sps:$4 sm:$0xff]  }
  0x85   : > { %1299 = vmatpush1.bf16.msra.mxu0 %v1878_v62 }
  0x86   : > { %1300 = vmatprep.subr.bf16.mxu0 %v1879_v63 }
  0x87   : > { %821 = vmatpush1.bf16.msra.mxu1 %v1791_v32  ;;  %v1846_v32 = vld [vmem:[%s2288_s26 + $0x188] ss:$16 sps:$4 sm:$0xff]  }
  0x88   : > { %822 = vmatprep.subr.bf16.mxu1 %v1792_v33  ;;  %v1851_v33 = vld [vmem:[%s2288_s26 + $0x1ac] ss:$16 sps:$4 sm:$0xff]  }
  0x89   : > { %1301 = vmatpush1.bf16.msra.mxu0 %v1881_v2 }
  0x8a   : > { %1302 = vmatprep.subr.bf16.mxu0 %v1882_v3 }
  0x8b   : > { %823 = vmatpush1.bf16.msra.mxu1 %v1794_v34  ;;  %v1849_v34 = vld [vmem:[%s2288_s26 + $0x1a8] ss:$16 sps:$4 sm:$0xff]  }
  0x8c   : > { %824 = vmatprep.subr.bf16.mxu1 %v1795_v35  ;;  %v1854_v35 = vld [vmem:[%s2288_s26 + $0x1cc] ss:$16 sps:$4 sm:$0xff]  }
  0x8d   : > { %1303 = vmatpush1.bf16.msra.mxu0 %v1884_v6  ;;  %v1911_v6 = vld [vmem:[%s2294_s14 + $0x114] ss:$8 sps:$4 sm:$0xff]  }
  0x8e   : > { %1304 = vmatprep.subr.bf16.mxu0 %v1885_v7  ;;  %v1909_v7 = vld [vmem:[%s2294_s14 + $0x110] ss:$8 sps:$4 sm:$0xff]  }
  0x8f   : > { %825 = vmatpush1.bf16.msra.mxu1 %v1797_v38  ;;  %v1855_v38 = vld [vmem:[%s2288_s26 + $0x1e8] ss:$16 sps:$4 sm:$0xff]  }
  0x90   : > { %826 = vmatprep.subr.bf16.mxu1 %v1798_v40  ;;  %v1900_v40 = vld [vmem:[%s2294_s14 + $0xe4] ss:$8 sps:$4 sm:$0xff]  }
  0x91   : > { %1305 = vmatpush1.bf16.msra.mxu0 %v1887_v10  ;;  %v1917_v10 = vld [vmem:[%s2294_s14 + $0x134] ss:$8 sps:$4 sm:$0xff]  }
  0x92   : > { %1306 = vmatprep.subr.bf16.mxu0 %v1888_v11  ;;  %v1915_v11 = vld [vmem:[%s2294_s14 + $0x130] ss:$8 sps:$4 sm:$0xff]  }
  0x93   : > { %827 = vmatpush1.bf16.msra.mxu1 %v1800_v43  ;;  %v1905_v43 = vld [vmem:[%s2294_s14 + $0xf0] ss:$8 sps:$4 sm:$0xff]  }
  0x94   : > { %828 = vmatprep.subr.bf16.mxu1 %v1801_v44  ;;  %v1908_v44 = vld [vmem:[%s2294_s14 + $0x104] ss:$8 sps:$4 sm:$0xff]  }
  0x95   : > { %1307 = vmatpush1.bf16.msra.mxu0 %v1890_v14  ;;  %v1923_v14 = vld [vmem:[%s2294_s14 + $0x154] ss:$8 sps:$4 sm:$0xff]  }
  0x96   : > { %1308 = vmatprep.subr.bf16.mxu0 %v1891_v15  ;;  %v1921_v15 = vld [vmem:[%s2294_s14 + $0x150] ss:$8 sps:$4 sm:$0xff]  }
  0x97   : > { %829 = vmatpush1.bf16.msra.mxu1 %v1803_v47  ;;  %v431_v47 = vld [vmem:[%s332_s12] sm:$0xf] }
  0x98   : > { %830 = vmatprep.subr.bf16.mxu1 %v1804_v48  ;;  %v2429_v48 = vunpack.c.l.bf16 %v431_v47 }
  0x99   : > { %1309 = vmatpush1.bf16.msra.mxu0 %v1893_v18  ;;  %v1929_v18 = vld [vmem:[%s2294_s14 + $0x174] ss:$8 sps:$4 sm:$0xff]  }
  0x9a   : > { %1310 = vmatprep.subr.bf16.mxu0 %v1894_v19  ;;  %v1927_v19 = vld [vmem:[%s2294_s14 + $0x170] ss:$8 sps:$4 sm:$0xff]  }
  0x9b   : > { %831 = vmatpush1.bf16.msra.mxu1 %v1806_v51  ;;  %v437_v51 = vrot.slane %v2429_v48, %v2432_v49 }
  0x9c   : > { %843 = vmatprep.subr.bf16.mxu1 %v1812_v52  ;;  %v441_v52 = vrot.slane %v2429_v48, %v440_v50  ;;  %v1951_v50 = vld [vmem:[%s2294_s14 + $0x1f0] ss:$8 sps:$4 sm:$0xff]  }
  0x9d   : > { %1311 = vmatpush1.bf16.msra.mxu0 %v1896_v22  ;;  %v457_v53 = vrot.slane %v437_v51, %v2432_v49  ;;  %v1935_v22 = vld [vmem:[%s2294_s14 + $0x194] ss:$8 sps:$4 sm:$0xff]  }
  0x9e   : > { %833 = vmatmul.mubr.bf16.vlgmr.msra.gmra.mrb[0].mxu1 %v2363_v54 }
  0x9f   : > { %844 = vmatpush1.bf16.msra.mxu1 %v1810_v56  ;;  %875 = vmatprep.mubr.bf16.mxu1 %v2327_v23  ;;  %v1897_v23 = vld [vmem:[%s2294_s14 + $0xd4] ss:$8 sps:$4 sm:$0xff]  }
  0xa0   : > { %845 = vmatprep.subr.bf16.mxu1 %v1815_v57  ;;  %1312 = vmatprep.subr.bf16.mxu0 %v1897_v23  ;;  %v1933_v23 = vld [vmem:[%s2294_s14 + $0x190] ss:$8 sps:$4 sm:$0xff]  }
  0xa1   : > { %1313 = vmatpush1.bf16.msra.mxu0 %v1899_v39 }
  0xa2   : > { %1314 = vmatprep.subr.bf16.mxu0 %v1900_v40  ;;  %v1948_v40 = vld [vmem:[%s2294_s14 + $0x1e0] ss:$8 sps:$4 sm:$0xff]  }
  0xa3   : > { %846 = vmatpush1.bf16.msra.mxu1 %v1813_v60 }
  0xa4   : > { %847 = vmatprep.subr.bf16.mxu1 %v1818_v61 }
  0xa5   : > { %1315 = vmatpush1.bf16.msra.mxu0 %v1902_v41 }
  0xa6   : > { %1316 = vmatprep.subr.bf16.mxu0 %v1903_v42 }
  0xa7   : > { %848 = vmatpush1.bf16.msra.mxu1 %v1816_v0 }
  0xa8   : > { %849 = vmatprep.subr.bf16.mxu1 %v1821_v1 }
  0xa9   : > { %1317 = vmatpush1.bf16.msra.mxu0 %v1905_v43  ;;  %v1953_v43 = vld [vmem:[%s2294_s14 + $0x1f4] ss:$8 sps:$4 sm:$0xff]  }
  0xaa   : > { %1329 = vmatprep.subr.bf16.mxu0 %v1908_v44 }
  0xab   : > { %850 = vmatpush1.bf16.msra.mxu1 %v1819_v4 }
  0xac   : > { %851 = vmatprep.subr.bf16.mxu1 %v1824_v5  ;;  %v1906_v5 = vld [vmem:[%s2294_s14 + $0x100] ss:$8 sps:$4 sm:$0xff]  }
  0xaf   : > { %852 = vmatpush1.bf16.msra.mxu1 %v1822_v8  ;;  %v1914_v8 = vld [vmem:[%s2294_s14 + $0x124] ss:$8 sps:$4 sm:$0xff]  }
  0xb0   : > { %853 = vmatprep.subr.bf16.mxu1 %v1827_v9  ;;  %v1912_v9 = vld [vmem:[%s2294_s14 + $0x120] ss:$8 sps:$4 sm:$0xff]  }
  0xb3   : > { %854 = vmatpush1.bf16.msra.mxu1 %v1825_v12  ;;  %v1920_v12 = vld [vmem:[%s2294_s14 + $0x144] ss:$8 sps:$4 sm:$0xff]  }
  0xb4   : > { %855 = vmatprep.subr.bf16.mxu1 %v1830_v13  ;;  %v1918_v13 = vld [vmem:[%s2294_s14 + $0x140] ss:$8 sps:$4 sm:$0xff]  }
  0xb7   : > { %856 = vmatpush1.bf16.msra.mxu1 %v1828_v16  ;;  %v1926_v16 = vld [vmem:[%s2294_s14 + $0x164] ss:$8 sps:$4 sm:$0xff]  }
  0xb8   : > { %857 = vmatprep.subr.bf16.mxu1 %v1833_v17  ;;  %v1924_v17 = vld [vmem:[%s2294_s14 + $0x160] ss:$8 sps:$4 sm:$0xff]  }
  0xbb   : > { %858 = vmatpush1.bf16.msra.mxu1 %v1831_v20  ;;  %v1932_v20 = vld [vmem:[%s2294_s14 + $0x184] ss:$8 sps:$4 sm:$0xff]  }
  0xbc   : > { %859 = vmatprep.subr.bf16.mxu1 %v1836_v21  ;;  %v1930_v21 = vld [vmem:[%s2294_s14 + $0x180] ss:$8 sps:$4 sm:$0xff]  }
  0xbf   : > { %860 = vmatpush1.bf16.msra.mxu1 %v1834_v24  ;;  %v1938_v24 = vld [vmem:[%s2294_s14 + $0x1a4] ss:$8 sps:$4 sm:$0xff]  }
  0xc0   : > { %861 = vmatprep.subr.bf16.mxu1 %v1839_v25  ;;  %v1936_v25 = vld [vmem:[%s2294_s14 + $0x1a0] ss:$8 sps:$4 sm:$0xff]  }
  0xc3   : > { %862 = vmatpush1.bf16.msra.mxu1 %v1837_v26  ;;  %v1941_v26 = vld [vmem:[%s2294_s14 + $0x1b4] ss:$8 sps:$4 sm:$0xff]  }
  0xc4   : > { %863 = vmatprep.subr.bf16.mxu1 %v1842_v27  ;;  %v1939_v27 = vld [vmem:[%s2294_s14 + $0x1b0] ss:$8 sps:$4 sm:$0xff]  }
  0xc7   : > { %864 = vmatpush1.bf16.msra.mxu1 %v1840_v28  ;;  %v1944_v28 = vld [vmem:[%s2294_s14 + $0x1c4] ss:$8 sps:$4 sm:$0xff]  }
  0xc8   : > { %865 = vmatprep.subr.bf16.mxu1 %v1845_v29  ;;  %v444_v29 = vsub.s32 4, %v2422_v46 }
  0xcb   : > { %866 = vmatpush1.bf16.msra.mxu1 %v1843_v30  ;;  %v448_v30 = vsub.s32 6, %v2422_v46 }
  0xcc   : > { %867 = vmatprep.subr.bf16.mxu1 %v1848_v31  ;;  %v1942_v31 = vld [vmem:[%s2294_s14 + $0x1c0] ss:$8 sps:$4 sm:$0xff]  }
  0xcf   : > { %868 = vmatpush1.bf16.msra.mxu1 %v1846_v32  ;;  %v1947_v32 = vld [vmem:[%s2294_s14 + $0x1d4] ss:$8 sps:$4 sm:$0xff]  }
  0xd0   : > { %869 = vmatprep.subr.bf16.mxu1 %v1851_v33  ;;  %v445_v33 = vrot.slane %v2429_v48, %v444_v29 }
  0xd3   : > { %870 = vmatpush1.bf16.msra.mxu1 %v1849_v34  ;;  %v449_v34 = vrot.slane %v2429_v48, %v448_v30 }
  0xd4   : > { %871 = vmatprep.subr.bf16.mxu1 %v1854_v35  ;;  %v1945_v35 = vld [vmem:[%s2294_s14 + $0x1d0] ss:$8 sps:$4 sm:$0xff]  }
  0xd7   : > { %872 = vmatpush1.bf16.msra.mxu1 %v1852_v36  ;;  %v465_v36 = vrot.slane %v445_v33, %v2432_v49 }
  0xd8   : > { %873 = vmatprep.subr.bf16.mxu1 %v1857_v37  ;;  %v1950_v37 = vld [vmem:[%s2294_s14 + $0x1e4] ss:$8 sps:$4 sm:$0xff]  }
  0xdb   : > { %874 = vmatpush1.bf16.msra.mxu1 %v1855_v38  ;;  %v469_v38 = vrot.slane %v449_v34, %v2432_v49 }
  0xde   : > { %876 = vmatmul.mubr.bf16.vlgmr.msra.gmra.mrb[4].mxu1 %v2363_v54  ;;  %v461_v54 = vrot.slane %v441_v52, %v2432_v49 }
 0x171   : > { %v834_v55 = vpop.f32.mrb[0].mxu1 }
 0x172   : > { %v835_v56 = vadd.f32 %v834_v55, %v457_v53  ;;  %v836_v57 = vpop.f32.mrb[1].mxu1 }
 0x173   : > { %v837_v58 = vadd.f32 %v836_v57, %v461_v54  ;;  %v838_v59 = vpop.f32.mrb[2].mxu1  ;;  %v895_v57 = vld [vmem:[#allocation2 + $0x8] sm:$0xff] }
 0x174   : > { %v886_v60 = vmax.f32 %v835_v56, 0.0  ;;  %v839_v61 = vadd.f32 %v838_v59, %v457_v53  ;;  %v840_v62 = vpop.f32.mrb[3].mxu1  ;;  %v894_v56 = vld [vmem:[#allocation2] sm:$0xff]  ;;  %v896_v59 = vld [vmem:[#allocation2 + $0x10] sm:$0xff] }
 0x175   : > { %v841_v63 = vadd.f32 %v840_v62, %v461_v54  ;;  %v887_v1 = vmax.f32 %v837_v58, 0.0  ;;  %v897_v62 = vld [vmem:[#allocation2 + $0x18] sm:$0xff] }
 0x176   : > { %v890_v0 = vmax.f32 %v839_v61, 0.0 }
 0x177   : > { %v891_v2 = vmax.f32 %v841_v63, 0.0 }
 0x178   : > { %v898_v3 = vpack.c.bf16 %v890_v0, %v886_v60 }
 0x179   : > { %v899_v4 = vpack.c.bf16 %v891_v2, %v887_v1 }
 0x17b   : > { %1318 = vmatprep.mubr.bf16.mxu0 %v899_v4 }
 0x17c   : > { %1319 = vmatmul.mubr.bf16.vlgmr.msra.gmra.mrb[0].mxu0 %v898_v3 }
 0x17d   : > { %1330 = vmatpush1.bf16.msra.mxu0 %v1906_v5 }
 0x17e   : > { %1331 = vmatprep.subr.bf16.mxu0 %v1911_v6 }
 0x181   : > { %1332 = vmatpush1.bf16.msra.mxu0 %v1909_v7 }
 0x182   : > { %1333 = vmatprep.subr.bf16.mxu0 %v1914_v8 }
 0x185   : > { %1334 = vmatpush1.bf16.msra.mxu0 %v1912_v9 }
 0x186   : > { %1335 = vmatprep.subr.bf16.mxu0 %v1917_v10 }
 0x189   : > { %1336 = vmatpush1.bf16.msra.mxu0 %v1915_v11 }
 0x18a   : > { %1337 = vmatprep.subr.bf16.mxu0 %v1920_v12 }
 0x18d   : > { %1338 = vmatpush1.bf16.msra.mxu0 %v1918_v13 }
 0x18e   : > { %1339 = vmatprep.subr.bf16.mxu0 %v1923_v14 }
 0x191   : > { %1340 = vmatpush1.bf16.msra.mxu0 %v1921_v15 }
 0x192   : > { %1341 = vmatprep.subr.bf16.mxu0 %v1926_v16 }
 0x195   : > { %1342 = vmatpush1.bf16.msra.mxu0 %v1924_v17 }
 0x196   : > { %1343 = vmatprep.subr.bf16.mxu0 %v1929_v18 }
 0x199   : > { %1344 = vmatpush1.bf16.msra.mxu0 %v1927_v19 }
 0x19a   : > { %1345 = vmatprep.subr.bf16.mxu0 %v1932_v20 }
 0x19d   : > { %1346 = vmatpush1.bf16.msra.mxu0 %v1930_v21 }
 0x19e   : > { %1347 = vmatprep.subr.bf16.mxu0 %v1935_v22 }
 0x1a1   : > { %1348 = vmatpush1.bf16.msra.mxu0 %v1933_v23 }
 0x1a2   : > { %1349 = vmatprep.subr.bf16.mxu0 %v1938_v24 }
 0x1a5   : > { %1350 = vmatpush1.bf16.msra.mxu0 %v1936_v25 }
 0x1a6   : > { %1351 = vmatprep.subr.bf16.mxu0 %v1941_v26 }
 0x1a9   : > { %1352 = vmatpush1.bf16.msra.mxu0 %v1939_v27 }
 0x1aa   : > { %1353 = vmatprep.subr.bf16.mxu0 %v1944_v28 }
 0x1ad   : > { %1354 = vmatpush1.bf16.msra.mxu0 %v1942_v31 }
 0x1ae   : > { %1355 = vmatprep.subr.bf16.mxu0 %v1947_v32 }
 0x1b1   : > { %v877_v39 = vpop.f32.mrb[4].mxu1  ;;  %1356 = vmatpush1.bf16.msra.mxu0 %v1945_v35 }
 0x1b2   : > { %v878_v41 = vadd.f32 %v877_v39, %v465_v36  ;;  %v879_v42 = vpop.f32.mrb[5].mxu1  ;;  %1357 = vmatprep.subr.bf16.mxu0 %v1950_v37 }
 0x1b3   : > { %v880_v44 = vadd.f32 %v879_v42, %v469_v38  ;;  %v881_v45 = vpop.f32.mrb[6].mxu1 }
 0x1b4   : > { %v882_v46 = vadd.f32 %v881_v45, %v465_v36  ;;  %v883_v47 = vpop.f32.mrb[7].mxu1  ;;  %v888_v51 = vmax.f32 %v878_v41, 0.0 }
 0x1b5   : > { %v884_v48 = vadd.f32 %v883_v47, %v469_v38  ;;  %1358 = vmatpush1.bf16.msra.mxu0 %v1948_v40  ;;  %v889_v53 = vmax.f32 %v880_v44, 0.0 }
 0x1b6   : > { %v892_v52 = vmax.f32 %v882_v46, 0.0  ;;  %1359 = vmatprep.subr.bf16.mxu0 %v1953_v43 }
 0x1b7   : > { %v893_v54 = vmax.f32 %v884_v48, 0.0 }
 0x1b8   : > { %v900_v49 = vpack.c.bf16 %v892_v52, %v888_v51 }
 0x1b9   : > { %v901_v55 = vpack.c.bf16 %v893_v54, %v889_v53  ;;  %1360 = vmatpush1.bf16.msra.mxu0 %v1951_v50 }
 0x1bb   : > { %1361 = vmatprep.mubr.bf16.mxu0 %v901_v55 }
 0x1bc   : > { %1362 = vmatmul.mubr.bf16.vlgmr.msra.gmra.mrb[0].mxu0 %v900_v49 }
 0x28f   : > { %v1363_v58 = vpop.f32.mrb[0].mxu0  ;;  %1383 = sbr.rel (%p1669_p4) target bundleno = 672 (0x2a0), region = 56 }
 0x290   : > { %v1372_v60 = vadd.f32 %v1363_v58, %v894_v56  ;;  %v1365_v61 = vpop.f32.mrb[1].mxu0 }
 0x291   : > { %v1373_v63 = vadd.f32 %v1365_v61, %v895_v57  ;;  %v1367_v0 = vpop.f32.mrb[2].mxu0 }
 0x292   : > { %1376 = vst [vmem:[#allocation2] sm:$0xff] %v1372_v60  ;;  %v1374_v1 = vadd.f32 %v1367_v0, %v896_v59  ;;  %v1369_v2 = vpop.f32.mrb[3].mxu0 }
 0x293   : > { %1377 = vst [vmem:[#allocation2 + $0x8] sm:$0xff] %v1373_v63  ;;  %v1375_v3 = vadd.f32 %v1369_v2, %v897_v62 }
 0x294   : > { %1378 = vst [vmem:[#allocation2 + $0x10] sm:$0xff] %v1374_v1 }
 0x295   : > { %1379 = vst [vmem:[#allocation2 + $0x18] sm:$0xff] %v1375_v3 }
 0x299   : > { %v1384_v4 = vld [vmem:[#allocation2] sm:$0xff] }
 0x29a   : > { %v1385_v5 = vld [vmem:[#allocation2 + $0x8] sm:$0xff] }
 0x29b   : > { %v1386_v6 = vld [vmem:[#allocation2 + $0x10] sm:$0xff]  ;;  %v1679_v7 = vpack.c.bf16 %v1385_v5, %v1384_v4 }
 0x29c   : > { %v1387_v8 = vld [vmem:[#allocation2 + $0x18] sm:$0xff] }
 0x29d   : > { %v1680_v9 = vpack.c.bf16 %v1387_v8, %v1386_v6  ;;  %1400 = vst [vmem:[#allocation8] sm:$0xff] %v1679_v7 }
 0x29f   : > { %1401 = vst [vmem:[#allocation8 + $0x8] sm:$0xff] %v1680_v9 }
 0x2a0 PF: > { %p2480_p8 = scmp.eq.s32.totalorder %s1523_s24, 1  ;;  %s2107_s18 = smov [#allocation8]  }
 0x2a1   : > { %s1412_s26 = sshll.u32 %s2107_s18, 4  ;;  %s1413_s26 = int_to_ptr.vmem [resolvable:$true] %s1412_s26 }
 0x2a2   : > { %s2014_s21 = scalar_lea.vmem %s1413_s26, 256  ;;  %p2021_p10 = scmp.lt.s32.totalorder %s1413_s26, %s1413_s26 }
 0x2a3   : > { %p2015_p2 = scmp.ne.s32.totalorder %s1413_s26, %s2014_s21  ;;  %p2022_p5 = scmp.lt.s32.totalorder %s2014_s21, %s2014_s21 }
 0x2a5   : > { %p2016_p3 = pnand %p2015_p2, %p2480_p8  ;;  %p2023_p6 = por %p2022_p5, %p2021_p10 }
 0x2a7   : > { %p2017_p0 = pneg %p2016_p3 }
 0x2a9   : > { %p2024_p11 = pnand %p2023_p6, %p2017_p0 }
 0x2ab   : > { %2027 = shalt.err (!%p2024_p11)
}
 0x2ac   : > { %s2028_s24 = scalar_lea.hbm %s2529_s5, 256 }
 0x2ad   : > { %p2029_p13 = scmp.ne.s32.totalorder %s2529_s5, %s2028_s24  ;;  %p2034_p9 = scmp.lt.u32.totalorder %s2028_s24, %s2529_s5 }
 0x2af   : > { %p2030_p1 = pnand %p2029_p13, %p2480_p8 }
 0x2b1   : > { %p2031_p7 = pneg %p2030_p1 }
 0x2b3   : > { %p2036_p12 = pnand %p2034_p9, %p2031_p7 }
 0x2b5   : > { %2039 = shalt.err (!%p2036_p12)
}
 0x2b6   : > { %s2108_s11 = smov 128   ;;  %s2109_s28 = smov 8  }
 0x2b7   : > { %1690 = dma.vmem_to_hbm [thread:$0]  (%p2480_p8), %s1413_s26, 256, %s2529_s5, [#allocation5], %s2108_s11, %s2108_s11, %s2109_s28  }
 0x2b8   : > { %2073 = dma.done.wait (%p2480_p8), [#allocation5], 256  }
 0x2b9   : > { %2075 = vsyncadd (%p2480_p8), [#allocation5], 4294967040 }
 0x2ba PF: > { %s22_s23 = sadd.s32 1, %s2098_s23   ;;  %s2538_s18 = smov %s2082_s19 }
 0x2bb   : > { %p19_p4 = scmp.ge.s32.totalorder %s22_s23, 4   ;;  %s2539_s19 = smov %s2086_s20 }
 0x2bc   : > { %s2540_s20 = smov %s2191_s30  ;;  %s2541_s21 = smov %s2094_s22 }
 0x2bd   : > { %s2542_s22 = smov %s2544_s25  ;;  %21 = sbr.rel (!%p19_p4) target bundleno = 7 (0x7), region = 105 }
 0x2c4   :  { %1428 = vsyncpa [#allocation4], 1 }
 0x2c5   :  { %1430 = vsyncpa [#allocation4 + $0x1], 1 }
 0x2c6   :  { %1431 = vsyncpa [#allocation7], 1 }
 0x2c7   :  { %1433 = vsyncpa [#allocation7 + $0x1], 1 }
 0x2c8   :  { %1434 = vsyncpa [#allocation5], 1 }
 0x2c9   :  { %1436 = vsyncpa [#allocation5 + $0x1], 1 }

</bundles_post_ra>
